<compile_context>
chip_gen: v6e
topology: v6e:2x2x1
jax: 0.10.0
libtpu: 0.0.40
codegen_flags: <defaults>
</compile_context>

<pallas_src>
import jax
import jax.numpy as jnp
from jax.experimental import pallas as pl
from jax.experimental.pallas import tpu as pltpu


def _drop_path_kernel(scale_ref, x_ref, o_ref):
    # out = x * (mask / keep_prob); (TB, 1) scale broadcast over the lane axis.
    o_ref[...] = (x_ref[...] * scale_ref[...]).astype(o_ref.dtype)


def _drop_path_residual_kernel(scale_ref, x_ref, r_ref, o_ref):
    # Fused residual add: out = residual + x * (mask / keep_prob).
    o_ref[...] = (r_ref[...] + x_ref[...] * scale_ref[...]).astype(o_ref.dtype)


def _choose_tiles(B, M, itemsize):
    """VMEM-budget-driven tiles (~2 MiB per buffer): 2x(in) + 2x(out) double-buffered
    blocks stay well under the scoped-VMEM defaults on v5e (16 MiB), v6e (32 MiB) and
    v7x (32 MiB scoped / 64 MiB physical)."""
    pack = {4: 8, 2: 16, 1: 32}.get(itemsize, 8)      # sublane packing per dtype
    target_bytes = 2 * 1024 * 1024

    # M-axis tile: multiple of 128 (lane-dense), or the full row if M doesn't divide.
    if M % 128 == 0 and M > 128:
        max_tm = max(128, ((target_bytes // (pack * itemsize)) // 128) * 128)
        TM = min(M, max_tm)
    else:
        TM = M                                        # block dim == full array dim is legal

    # Batch tile from remaining budget, aligned to the sublane pack.
    rows = max(pack, target_bytes // max(1, TM * itemsize))
    TB = min(B, (rows // pack) * pack)
    if TB <= 0:
        TB = min(B, pack)
    if TB >= B:
        TB = B
        # Give v7x's two TensorCores at least 2 grid points along the parallel batch axis.
        if B >= 2 * pack:
            TB = max(pack, ((B // 2) // pack) * pack)
    return TB, TM


def drop_path_pallas(x, drop_prob=0.0, training=False, *, key=None, seed=0,
                     residual=None):
    """Pallas equivalent of models/STAM.py::DropPath.forward (x: (B, ...)).

    NOTE: the drop mask is fully determined by `key`/`seed`; callers must vary it
    per training step (unlike PyTorch's implicit global RNG).
    If `residual` is given, returns residual + drop_path(x) fused in one pass.
    """
    if drop_prob == 0.0 or not training:
        return x if residual is None else x + residual

    keep_prob = 1.0 - float(drop_prob)
    orig_shape = x.shape
    B = orig_shape[0]
    M = 1
    for d in orig_shape[1:]:
        M *= d
    x2 = x.reshape(B, M)

    # Per-sample Bernoulli scale, hoisted out of the kernel (plain JAX, one shot).
    if key is None:
        key = jax.random.PRNGKey(seed)
    u = jax.random.uniform(key, (B, 1), dtype=jnp.float32)
    mask = jnp.floor(keep_prob + u)                   # {0, 1}, torch semantics
    scale = mask * (1.0 / keep_prob)                  # (B, 1) f32

    TB, TM = _choose_tiles(B, M, jnp.dtype(x.dtype).itemsize)
    grid = (pl.cdiv(B, TB), pl.cdiv(M, TM))

    scale_spec = pl.BlockSpec((TB, 1), lambda i, j: (i, 0))
    x_spec = pl.BlockSpec((TB, TM), lambda i, j: (i, j))
    common = dict(
        out_shape=jax.ShapeDtypeStruct((B, M), x.dtype),
        grid=grid,
        out_specs=pl.BlockSpec((TB, TM), lambda i, j: (i, j)),
        compiler_params=pltpu.CompilerParams(
            dimension_semantics=("parallel", "parallel")),
    )

    if residual is None:
        out2 = pl.pallas_call(
            _drop_path_kernel,
            in_specs=[scale_spec, x_spec],
            **common,
        )(scale, x2)
    else:
        r2 = residual.reshape(B, M)
        out2 = pl.pallas_call(
            _drop_path_residual_kernel,
            in_specs=[scale_spec, x_spec, x_spec],
            **common,
        )(scale, x2, r2)

    return out2.reshape(orig_shape)


if __name__ == "__main__":
    # Shapes consistent with STAM usage: DropPath acts on (B, N, C) token residuals.
    drop_prob = 0.5
    keep_prob = 1.0 - drop_prob

    key = jax.random.PRNGKey(0)
    kx, kr, kmask = jax.random.split(key, 3)

    B, N, C = 2, 8, 32
    x = jax.random.normal(kx, (B, N, C), dtype=jnp.float32)

    # Training path through the Pallas kernel.
    out = drop_path_pallas(x, drop_prob=drop_prob, training=True, key=kmask)
    out = jax.block_until_ready(out)
    assert out.shape == x.shape

    # Reference: the same hoisted per-sample mask applied in plain JAX.
    u = jax.random.uniform(kmask, (B, 1), dtype=jnp.float32)
    ref = x * (jnp.floor(keep_prob + u) / keep_prob).reshape(B, 1, 1)
    assert jnp.allclose(out, ref, atol=1e-6, rtol=1e-6)

    # Each sample must be either exactly dropped (all zeros) or scaled by 1/keep_prob.
    for b in range(B):
        zeroed = bool(jnp.allclose(out[b], 0.0, atol=1e-6))
        scaled = bool(jnp.allclose(out[b], x[b] / keep_prob, atol=1e-5, rtol=1e-5))
        assert zeroed or scaled, f"sample {b}: not a valid DropPath output"

    # Larger batch exercises the multi-block (tiled, >=2 grid points) path.
    B2 = 16
    xb = jax.random.normal(kx, (B2, N, C), dtype=jnp.float32)
    outb = jax.block_until_ready(
        drop_path_pallas(xb, drop_prob=drop_prob, training=True, key=kmask))
    ub = jax.random.uniform(kmask, (B2, 1), dtype=jnp.float32)
    refb = xb * (jnp.floor(keep_prob + ub) / keep_prob).reshape(B2, 1, 1)
    assert jnp.allclose(outb, refb, atol=1e-6, rtol=1e-6)

    # Fused residual variant (residual + drop_path(x)) in one HBM pass.
    res = jax.random.normal(kr, (B, N, C), dtype=jnp.float32)
    out_fused = jax.block_until_ready(
        drop_path_pallas(x, drop_prob=drop_prob, training=True, key=kmask,
                         residual=res))
    assert jnp.allclose(out_fused, res + ref, atol=1e-5, rtol=1e-5)

    # Eval mode / drop_prob == 0: identity, matching the PyTorch short-circuit.
    assert drop_path_pallas(x, drop_prob=drop_prob, training=False) is x
    assert drop_path_pallas(x, drop_prob=0.0, training=True) is x

    print("KERNEL_OK")
</pallas_src>

<mosaic_0001>
module attributes {stable_mosaic.version = 11 : i64} {
  func.func @_drop_path_kernel(%arg0: i32, %arg1: i32, %arg2: memref<2x1xf32, #tpu.memory_space<vmem>>, %arg3: memref<2x256xf32, #tpu.memory_space<vmem>>, %arg4: memref<2x256xf32, #tpu.memory_space<vmem>>) attributes {dimension_semantics = [#tpu.dimension_semantics<parallel>, #tpu.dimension_semantics<parallel>], iteration_bounds = array<i64: 1, 1>, scalar_prefetch = 0 : i64, scratch_operands = 0 : i64, tpu.core_type = #tpu.core_type<tc>, window_params = [{transform_indices = @transform_0, window_bounds = array<i64: 2, 1>}, {transform_indices = @transform_1, window_bounds = array<i64: 2, 256>}, {transform_indices = @transform_2, window_bounds = array<i64: 2, 256>}]} {
    %c0 = arith.constant 0 : index
    %c0_0 = arith.constant 0 : index
    %0 = vector.load %arg3[%c0, %c0_0] : memref<2x256xf32, #tpu.memory_space<vmem>>, vector<2x256xf32>
    %c0_1 = arith.constant 0 : index
    %c0_2 = arith.constant 0 : index
    %1 = vector.load %arg2[%c0_1, %c0_2] : memref<2x1xf32, #tpu.memory_space<vmem>>, vector<2x1xf32>
    %2 = vector.broadcast %1 : vector<2x1xf32> to vector<2x256xf32>
    %3 = arith.mulf %0, %2 : vector<2x256xf32>
    %c0_3 = arith.constant 0 : index
    %c0_4 = arith.constant 0 : index
    %4 = vector.load %arg4[%c0_3, %c0_4] : memref<2x256xf32, #tpu.memory_space<vmem>>, vector<2x256xf32>
    tpu.vector_store %arg4[%c0_3, %c0_4], %3 {strides = array<i32>} : memref<2x256xf32, #tpu.memory_space<vmem>>, vector<2x256xf32>,
    return
  }
  func.func @transform_0(%arg0: i32, %arg1: i32) -> (i32, i32) {
    %c0_i32 = arith.constant 0 : i32
    %c0_i32_0 = arith.constant 0 : i32
    return %arg0, %c0_i32 : i32, i32
  }
  func.func @transform_1(%arg0: i32, %arg1: i32) -> (i32, i32) {
    %c0_i32 = arith.constant 0 : i32
    return %arg0, %arg1 : i32, i32
  }
  func.func @transform_2(%arg0: i32, %arg1: i32) -> (i32, i32) {
    %c0_i32 = arith.constant 0 : i32
    return %arg0, %arg1 : i32, i32
  }
}

</mosaic_0001>

<bundles_post_ra>
// kernel: tpu_custom_call.1
= control target key start
LH: loop header
LB: loop body
LE: loop exit
PB: predicated region body
PF: predicated region fallthrough
CT: control target
= control target key end

     0   :  { %v68_v1 = vmov 0   ;;  %s95_s0 = inlined_call_operand.vmem [shape: f32[2,1], index: 0, kind: input, shape index: {}]   ;;  %s96_s1 = inlined_call_operand.vmem [shape: f32[2,256], index: 1, kind: input, shape index: {}]   ;;  %s97_s2 = inlined_call_operand.hbm [shape: f32[2,256], index: 2, kind: output, shape index: {}]  }
   0x1   :  { %v13_v0 = vld [vmem:[%s95_s0] sm:$0x3]  ;;  %45 = vset.pattern.permute.xlu0 %v68_v1 }
   0x2   :  { %7 = vsyncpa [#allocation3], 0  ;;  %16 = vperm.xlu0 %45, %v13_v0   ;;  %v69_v2 = vmov 269488144   ;;  %v21_v4 = vlaneseq  ;;  %v12_v9 = vld [vmem:[%s96_s1] sm:$0xf] }
   0x3   :  { %v19_v3 = vunpack.c.l.s4 %v69_v2  ;;  %s70_s13 = smov [#allocation2]  }
   0x4   :  { %v22_v6 = vshrl.u32 %v21_v4, 7  ;;  %s34_s14 = sshll.u32 %s70_s13, 4  ;;  %s35_s14 = int_to_ptr.vmem [resolvable:$true] %s34_s14 }
   0x5   :  { %v20_v5 = vunpack.c.0.s8 %v19_v3  ;;  %s46_s0 = scalar_lea.vmem %s35_s14, 64  ;;  %p51_p1 = scmp.lt.s32.totalorder %s35_s14, %s35_s14 }
   0x6   :  { %p47_p0 = scmp.ne.s32.totalorder %s35_s14, %s46_s0  ;;  %p52_p2 = scmp.lt.s32.totalorder %s46_s0, %s46_s0 }
   0x7   :  { %v23_v7 = vsub.s32 %v20_v5, %v22_v6 }
   0x8   :  { %p53_p3 = por %p52_p2, %p51_p1 }
   0xa   :  { %p54_p4 = pnand %p53_p3, %p47_p0 }
  0x7d   :  { %v17_v8 = vpop.permute.xlu0 %16 }
  0x7e   :  { %v24_v10 = vrot.slane %v17_v8, %v23_v7 }
  0x80   :  { %v26_v11 = vmul.f32 %v24_v10, %v12_v9 }
  0x82   :  { %27 = vst [vmem:[#allocation2] sm:$0xf] %v26_v11 }
  0x83   :  { %57 = shalt.err (!%p54_p4)
}
  0x84   :  { %37 = dma.vmem_to_hbm [thread:$0]  %s35_s14, 64, %s97_s2, [#allocation3]  }
  0x85   :  { %66 = dma.done.wait [#allocation3], 64  }
  0x86   :  { %67 = vsyncadd [#allocation3], 4294967232 }
  0x87   :  { %41 = vsyncpa [#allocation3], 1 }

</bundles_post_ra>
